<compile_context>
chip_gen: v7x
topology: tpu7x:2x2x1
jax: 0.10.0
libtpu: 0.0.40
codegen_flags: <defaults>
</compile_context>

<pallas_src>
import functools

import jax
import jax.numpy as jnp
from jax.experimental import pallas as pl
from jax.experimental.pallas import tpu as pltpu


# ----------------------------------------------------------------------------
# Helpers
# ----------------------------------------------------------------------------
def _round_up(x, m):
    return ((x + m - 1) // m) * m


def _pick_tile(padded, max_tile, quantum):
    """Largest multiple-of-`quantum` tile <= max_tile that divides `padded`."""
    if padded <= max_tile:
        return padded
    t = (max_tile // quantum) * quantum
    while t > quantum and padded % t != 0:
        t -= quantum
    return t


# ----------------------------------------------------------------------------
# Kernel 1: XW = X_src @ W_etype, tiled over src nodes, bf16 output.
# (Hoisted out of the dst-tiled message-passing loop so it is computed once per
#  relation instead of once per dst tile.)
# ----------------------------------------------------------------------------
def _xw_kernel(x_ref, w_ref, o_ref):
    o_ref[...] = jnp.dot(x_ref[...], w_ref[...],
                         preferred_element_type=jnp.float32).astype(o_ref.dtype)


def compute_xw(x, w, n_src_pad, dout_pad, *, max_tile=512):
    """Zero-padded (n_src_pad, dout_pad) bf16 result of x @ w."""
    n_src, d_in = x.shape
    dout = w.shape[1]
    x_p = jnp.zeros((n_src_pad, d_in), jnp.bfloat16).at[:n_src, :].set(
        x.astype(jnp.bfloat16))
    w_p = jnp.zeros((d_in, dout_pad), jnp.bfloat16).at[:, :dout].set(
        w.astype(jnp.bfloat16))
    tile = _pick_tile(n_src_pad, max_tile, 128)
    return pl.pallas_call(
        _xw_kernel,
        out_shape=jax.ShapeDtypeStruct((n_src_pad, dout_pad), jnp.bfloat16),
        grid=(n_src_pad // tile,),
        in_specs=[
            pl.BlockSpec((tile, d_in), lambda i: (i, 0)),
            pl.BlockSpec((d_in, dout_pad), lambda i: (0, 0)),
        ],
        out_specs=pl.BlockSpec((tile, dout_pad), lambda i: (i, 0)),
        compiler_params=pltpu.CompilerParams(
            dimension_semantics=("parallel",)),
    )(x_p, w_p)


# ----------------------------------------------------------------------------
# Kernel 2: fused per-dst-node-type message passing + epilogue.
#   grid = (dst_tiles, relations, src_chunks)
#   acc(VMEM, f32) += adj_tile(bf16) @ xw_tile(bf16)      over (relations, chunks)
#   last step: h = relu(acc + bias); out = h / max(||h||_2, 1e-12)
# ----------------------------------------------------------------------------
def _rgcn_dst_kernel(adj_ref, xw_ref, b_ref, out_ref, acc_ref,
                     *, use_bias, use_relu):
    r = pl.program_id(1)
    s = pl.program_id(2)

    @pl.when(jnp.logical_and(r == 0, s == 0))
    def _():
        acc_ref[...] = jnp.zeros_like(acc_ref)

    acc_ref[...] += jnp.dot(adj_ref[0], xw_ref[0],
                            preferred_element_type=jnp.float32)

    @pl.when(jnp.logical_and(r == pl.num_programs(1) - 1,
                             s == pl.num_programs(2) - 1))
    def _():
        h = acc_ref[...]
        if use_bias:
            h = h + b_ref[...]            # (1, Dout_pad) broadcast over rows
        if use_relu:
            h = jnp.maximum(h, 0.0)
        # dropout with p=0.0 is the identity (eval semantics)
        sq = jnp.sum(h * h, axis=1, keepdims=True)
        # F.normalize(p=2, dim=1, eps=1e-12): h / max(||h||, 1e-12)
        # == h * rsqrt(max(||h||^2, 1e-24))  (EUP rsqrt instead of sqrt+divide)
        inv = jax.lax.rsqrt(jnp.maximum(sq, 1e-24))
        out_ref[...] = (h * inv).astype(out_ref.dtype)


def rgcn_dst_type(adj_stack, xw_stack, bias_pad, *, tile_m, tile_s,
                  use_bias, use_relu):
    num_rel, n_dst_pad, n_src_pad = adj_stack.shape
    dout_pad = xw_stack.shape[-1]
    kern = functools.partial(_rgcn_dst_kernel,
                             use_bias=use_bias, use_relu=use_relu)
    grid = (n_dst_pad // tile_m, num_rel, n_src_pad // tile_s)
    return pl.pallas_call(
        kern,
        out_shape=jax.ShapeDtypeStruct((n_dst_pad, dout_pad), jnp.float32),
        grid=grid,
        in_specs=[
            pl.BlockSpec((1, tile_m, tile_s), lambda i, r, s: (r, i, s)),
            pl.BlockSpec((1, tile_s, dout_pad), lambda i, r, s: (r, s, 0)),
            pl.BlockSpec((1, dout_pad), lambda i, r, s: (0, 0)),
        ],
        out_specs=pl.BlockSpec((tile_m, dout_pad), lambda i, r, s: (i, 0)),
        scratch_shapes=[pltpu.VMEM((tile_m, dout_pad), jnp.float32)],
        compiler_params=pltpu.CompilerParams(
            dimension_semantics=("parallel", "arbitrary", "arbitrary")),
    )(adj_stack, xw_stack, bias_pad)


# ----------------------------------------------------------------------------
# Wrapper implementing RelGraphConvLayer.forward (regularizer=None).
# ----------------------------------------------------------------------------
def rel_graph_conv_layer(ntype2features, etype2ntypes, etype2adj_norm,
                         etype2weight, h_bias, out_feat_dim,
                         *, use_bias=True, use_relu=True,
                         tile_m_max=256, tile_s_max=512):
    """ntype2features: dict[str, [N_nt, D_nt]] float32
       etype2adj_norm: dict[str, [N_dst, N_src]] symmetrically-normalized adjacency
       etype2weight:   dict[str, [D_src, out_feat_dim]]
       h_bias:         [out_feat_dim]"""
    dout_pad = _round_up(out_feat_dim, 128)
    bias_pad = jnp.zeros((1, dout_pad), jnp.float32).at[0, :out_feat_dim].set(
        jnp.reshape(h_bias, (-1,)).astype(jnp.float32))

    # Group relations by destination node type.
    dst2etypes = {}
    for etype, (_, dst_nt) in etype2ntypes.items():
        dst2etypes.setdefault(dst_nt, []).append(etype)

    out = {}
    for dst_nt, etypes in dst2etypes.items():
        n_dst = etype2adj_norm[etypes[0]].shape[0]
        n_dst_pad = _round_up(n_dst, 8)
        tile_m = _pick_tile(n_dst_pad, tile_m_max, 8)

        max_src = max(etype2adj_norm[e].shape[1] for e in etypes)
        n_src_pad = _round_up(max_src, 128)
        tile_s = _pick_tile(n_src_pad, tile_s_max, 128)

        adj_list, xw_list = [], []
        for etype in etypes:
            src_nt = etype2ntypes[etype][0]
            adj = etype2adj_norm[etype]
            a_p = jnp.zeros((n_dst_pad, n_src_pad), jnp.bfloat16)
            a_p = a_p.at[:adj.shape[0], :adj.shape[1]].set(adj.astype(jnp.bfloat16))
            adj_list.append(a_p)
            xw_list.append(compute_xw(ntype2features[src_nt], etype2weight[etype],
                                      n_src_pad, dout_pad, max_tile=tile_s_max))
        adj_stack = jnp.stack(adj_list, axis=0)   # [R, N_dst_pad, N_src_pad] bf16
        xw_stack = jnp.stack(xw_list, axis=0)     # [R, N_src_pad, Dout_pad]  bf16

        h_pad = rgcn_dst_type(adj_stack, xw_stack, bias_pad,
                              tile_m=tile_m, tile_s=tile_s,
                              use_bias=use_bias, use_relu=use_relu)
        out[dst_nt] = h_pad[:n_dst, :out_feat_dim]
    return out


# ----------------------------------------------------------------------------
# Graph normalization (norm='both', degrees clamped to >= 1) and init helpers.
# ----------------------------------------------------------------------------
def normalize_adj(adj):
    out_deg = jnp.clip(adj.sum(axis=0), 1.0, None)   # per-src out-degree
    in_deg = jnp.clip(adj.sum(axis=1), 1.0, None)    # per-dst in-degree
    return (1.0 / jnp.sqrt(in_deg))[:, None] * adj * (1.0 / jnp.sqrt(out_deg))[None, :]


def xavier_uniform(key, din, dout):
    bound = (6.0 / (din + dout)) ** 0.5
    return jax.random.uniform(key, (din, dout), jnp.float32, -bound, bound)


if __name__ == "__main__":
    key = jax.random.PRNGKey(0)

    # Heterogeneous graph config (small, deterministic)
    ntype2in_feat_dim = {"drug": 32, "protein": 16}
    ntype2num = {"drug": 16, "protein": 24}
    out_feat_dim = 32
    etype2ntypes = {
        "drug_drug": ("drug", "drug"),
        "drug_protein": ("drug", "protein"),
        "protein_drug": ("protein", "drug"),
    }

    keys = jax.random.split(key, 16)

    # Node features
    ntype2features = {
        "drug": jax.random.normal(keys[0], (ntype2num["drug"], 32), jnp.float32),
        "protein": jax.random.normal(keys[1], (ntype2num["protein"], 16), jnp.float32),
    }

    # Dense 0/1 adjacencies per relation: A[dst, src]
    etype2adj = {}
    for i, (etype, (src_nt, dst_nt)) in enumerate(etype2ntypes.items()):
        etype2adj[etype] = jax.random.bernoulli(
            keys[2 + i], 0.3, (ntype2num[dst_nt], ntype2num[src_nt])
        ).astype(jnp.float32)
    etype2adj_norm = {e: normalize_adj(a) for e, a in etype2adj.items()}

    # Parameters (regularizer=None -> one xavier_uniform weight per etype)
    etype2weight = {}
    for i, (etype, (src_nt, _)) in enumerate(etype2ntypes.items()):
        etype2weight[etype] = xavier_uniform(keys[8 + i],
                                             ntype2in_feat_dim[src_nt], out_feat_dim)
    h_bias = 0.1 * jax.random.normal(keys[12], (out_feat_dim,), jnp.float32)
    # TODO(synk): 'basis'/'bdd' regularizers (WeightBasis / BlockDiagDecomp) and
    # dropout p>0 (training mode) not instantiated; they only change how
    # etype2weight is built / are identity at eval with p=0.0.

    # Run Pallas implementation
    out = rel_graph_conv_layer(ntype2features, etype2ntypes, etype2adj_norm,
                               etype2weight, h_bias, out_feat_dim,
                               use_bias=True, use_relu=True)
    out = {k: jax.block_until_ready(v) for k, v in out.items()}

    # Pure-JAX reference (same bf16 operand rounding as the kernel; f32 accumulation)
    def bf(x):
        return x.astype(jnp.bfloat16).astype(jnp.float32)

    ref_acc = {}
    for etype, (src_nt, dst_nt) in etype2ntypes.items():
        xw = bf(jnp.dot(bf(ntype2features[src_nt]), bf(etype2weight[etype]),
                        preferred_element_type=jnp.float32))
        contrib = jnp.dot(bf(etype2adj_norm[etype]), xw,
                          preferred_element_type=jnp.float32)
        ref_acc[dst_nt] = ref_acc.get(dst_nt, 0.0) + contrib
    for nt, h in ref_acc.items():
        h = jnp.maximum(h + h_bias[None, :], 0.0)
        h = h / jnp.maximum(jnp.sqrt(jnp.sum(h * h, axis=1, keepdims=True)), 1e-12)
        assert out[nt].shape == (ntype2num[nt], out_feat_dim)
        assert jnp.allclose(out[nt], h, rtol=5e-3, atol=5e-3), f"mismatch for {nt}"

    print("KERNEL_OK")
</pallas_src>

<mosaic_0001>
module attributes {stable_mosaic.version = 11 : i64} {
  func.func @_xw_kernel(%arg0: i32, %arg1: memref<128x32xbf16, #tpu.memory_space<vmem>>, %arg2: memref<32x128xbf16, #tpu.memory_space<vmem>>, %arg3: memref<128x128xbf16, #tpu.memory_space<vmem>>) attributes {dimension_semantics = [#tpu.dimension_semantics<parallel>], iteration_bounds = array<i64: 1>, scalar_prefetch = 0 : i64, scratch_operands = 0 : i64, tpu.core_type = #tpu.core_type<tc>, window_params = [{transform_indices = @transform_0, window_bounds = array<i64: 128, 32>}, {pipeline_mode = #tpu.pipeline_mode<synchronous>, transform_indices = @transform_1, window_bounds = array<i64: 32, 128>}, {transform_indices = @transform_2, window_bounds = array<i64: 128, 128>}]} {
    %c0 = arith.constant 0 : index
    %c0_0 = arith.constant 0 : index
    %0 = vector.load %arg1[%c0, %c0_0] : memref<128x32xbf16, #tpu.memory_space<vmem>>, vector<128x32xbf16>
    %c0_1 = arith.constant 0 : index
    %c0_2 = arith.constant 0 : index
    %1 = vector.load %arg2[%c0_1, %c0_2] : memref<32x128xbf16, #tpu.memory_space<vmem>>, vector<32x128xbf16>
    %cst = arith.constant dense<0.000000e+00> : vector<128x128xf32>
    %2 = tpu.matmul %0, %1, %cst {dimension_numbers = #tpu.dot_dimension_numbers<[1], [0], [0], [1], [0, 0, 1, 1], [], []>} : vector<128x32xbf16>, vector<32x128xbf16>, vector<128x128xf32> -> vector<128x128xf32>
    %3 = arith.truncf %2 : vector<128x128xf32> to vector<128x128xbf16>
    %c0_3 = arith.constant 0 : index
    %c0_4 = arith.constant 0 : index
    %4 = vector.load %arg3[%c0_3, %c0_4] : memref<128x128xbf16, #tpu.memory_space<vmem>>, vector<128x128xbf16>
    tpu.vector_store %arg3[%c0_3, %c0_4], %3 {strides = array<i32>} : memref<128x128xbf16, #tpu.memory_space<vmem>>, vector<128x128xbf16>,
    return
  }
  func.func @transform_0(%arg0: i32) -> (i32, i32) {
    %c0_i32 = arith.constant 0 : i32
    %c0_i32_0 = arith.constant 0 : i32
    return %arg0, %c0_i32 : i32, i32
  }
  func.func @transform_1(%arg0: i32) -> (i32, i32) {
    %c0_i32 = arith.constant 0 : i32
    %c0_i32_0 = arith.constant 0 : i32
    %c0_i32_1 = arith.constant 0 : i32
    return %c0_i32, %c0_i32_0 : i32, i32
  }
  func.func @transform_2(%arg0: i32) -> (i32, i32) {
    %c0_i32 = arith.constant 0 : i32
    %c0_i32_0 = arith.constant 0 : i32
    return %arg0, %c0_i32 : i32, i32
  }
}

</mosaic_0001>

<bundles_post_ra>
// kernel: tpu_custom_call.1
= control target key start
LH: loop header
LB: loop body
LE: loop exit
PB: predicated region body
PF: predicated region fallthrough
CT: control target
= control target key end

     0   :  { %vm85_vm0 = vcmask 261120   ;;  %s539_s0 = inlined_call_operand.vmem [shape: bf16[128,32], index: 0, kind: input, shape index: {}]   ;;  %s540_s1 = inlined_call_operand.vmem [shape: bf16[32,128], index: 1, kind: input, shape index: {}]   ;;  %s541_s2 = inlined_call_operand.hbm [shape: bf16[128,128], index: 2, kind: output, shape index: {}]  }
   0x1   :  { %v437_v0 = vld [vmem:[%s540_s1] sm:$0xff]   ;;  %v438_v1 = vld [vmem:[%s540_s1 + $0x8] sm:$0xff]   ;;  %v443_v6 = vld [vmem:[%s539_s0 + $0x10] sm:$0xff]  }
   0x2   :  { %410 = vmatprep.subr.bf16.mxu0 %v437_v0  ;;  %430 = vmatprep.subr.bf16.mxu1 %v437_v0  ;;  %v439_v2 = vld [vmem:[%s539_s0] sm:$0xff]   ;;  %v441_v4 = vld [vmem:[%s539_s0 + $0x8] sm:$0xff]   ;;  %v444_v7 = vld [vmem:[%s539_s0 + $0x30] sm:$0xff]  }
   0x3   :  { %411 = vmatpush3.bf16.msra.mxu0 %v437_v0  ;;  %432 = vmatpush3.bf16.msra.mxu1 %v437_v0  ;;  %v440_v3 = vld [vmem:[%s539_s0 + $0x20] sm:$0xff]   ;;  %v442_v5 = vld [vmem:[%s539_s0 + $0x28] sm:$0xff]  }
   0x4   :  { %412 = vmatprep.subr.bf16.mxu0 %v438_v1  ;;  %431 = vmatprep.subr.bf16.mxu1 %v438_v1 }
   0x5   :  { %414 = vmatprep.mubr.msk.bf16.mxu0 %vm85_vm0, %v439_v2  ;;  %422 = vmatprep.mubr.msk.bf16.mxu1 %vm85_vm0, %v440_v3 }
   0x7   :  { %413 = vmatpush3.bf16.msra.mxu0 %v438_v1  ;;  %433 = vmatpush3.bf16.msra.mxu1 %v438_v1 }
   0xa   :  { %415 = vmatmul.mubr.msk.bf16.vlgmr.msra.gmra.mrb[0].mxu0 %vm85_vm0, %v441_v4  ;;  %423 = vmatmul.mubr.msk.bf16.vlgmr.msra.gmra.mrb[0].mxu1 %vm85_vm0, %v442_v5 }
   0xb   :  { %7 = vsyncpa [#allocation3], 0  ;;  %418 = vmatprep.mubr.msk.bf16.mxu0 %vm85_vm0, %v443_v6  ;;  %426 = vmatprep.mubr.msk.bf16.mxu1 %vm85_vm0, %v444_v7  ;;  %v445_v8 = vld [vmem:[%s539_s0 + $0x18] sm:$0xff]  }
   0xc   :  { %v446_v9 = vld [vmem:[%s539_s0 + $0x38] sm:$0xff]   ;;  %s471_s0 = smov [#allocation2]  }
   0xd   :  { %s292_s28 = sshll.u32 %s471_s0, 4  ;;  %s293_s28 = int_to_ptr.vmem [resolvable:$true] %s292_s28 }
   0xe   :  { %s447_s29 = scalar_lea.vmem %s293_s28, 1024  ;;  %p452_p1 = scmp.lt.s32.totalorder %s293_s28, %s293_s28 }
   0xf   :  { %p448_p0 = scmp.ne.s32.totalorder %s293_s28, %s447_s29  ;;  %p453_p2 = scmp.lt.s32.totalorder %s447_s29, %s447_s29 }
  0x11   :  { %p454_p3 = por %p453_p2, %p452_p1 }
  0x12   :  { %419 = vmatmul.mubr.msk.bf16.gmra.mrb[4].mxu0 %vm85_vm0, %v445_v8  ;;  %427 = vmatmul.mubr.msk.bf16.gmra.mrb[4].mxu1 %vm85_vm0, %v446_v9 }
  0x13   :  { %p455_p4 = pnand %p454_p3, %p448_p0 }
  0xdd   :  { %v416_v10 = vpop.f32.mrb[0].mxu0  ;;  %v424_v11 = vpop.f32.mrb[0].mxu1 }
  0xde   :  { %v144_v12 = vpop.f32.mrb[1].mxu0  ;;  %v176_v13 = vpop.f32.mrb[1].mxu1 }
  0xdf   :  { %v417_v14 = vpop.f32.mrb[2].mxu0  ;;  %v425_v15 = vpop.f32.mrb[2].mxu1 }
  0xe0   :  { %v361_v16 = vpack.c.bf16 %v417_v14, %v416_v10  ;;  %v381_v17 = vpack.c.bf16 %v425_v15, %v424_v11  ;;  %v147_v18 = vpop.f32.mrb[3].mxu0  ;;  %v179_v19 = vpop.f32.mrb[3].mxu1 }
  0xe1   :  { %v356_v20 = vpack.c.bf16 %v147_v18, %v144_v12  ;;  %v376_v21 = vpack.c.bf16 %v179_v19, %v176_v13 }
  0xe2   :  { %393 = vst [vmem:[#allocation2 + $0x8] sm:$0xff] %v361_v16   ;;  %397 = vst [vmem:[#allocation2 + $0x28] sm:$0xff] %v381_v17  }
  0xe3   :  { %357 = vst [vmem:[#allocation2] sm:$0xff] %v356_v20   ;;  %396 = vst [vmem:[#allocation2 + $0x20] sm:$0xff] %v376_v21  }
  0xe5   :  { %v420_v22 = vpop.f32.mrb[4].mxu0  ;;  %v428_v23 = vpop.f32.mrb[4].mxu1 }
  0xe6   :  { %v160_v24 = vpop.f32.mrb[5].mxu0  ;;  %v192_v25 = vpop.f32.mrb[5].mxu1 }
  0xe7   :  { %v421_v26 = vpop.f32.mrb[6].mxu0  ;;  %v429_v27 = vpop.f32.mrb[6].mxu1 }
  0xe8   :  { %v371_v28 = vpack.c.bf16 %v421_v26, %v420_v22  ;;  %v391_v29 = vpack.c.bf16 %v429_v27, %v428_v23  ;;  %v163_v30 = vpop.f32.mrb[7].mxu0  ;;  %v195_v31 = vpop.f32.mrb[7].mxu1 }
  0xe9   :  { %v366_v32 = vpack.c.bf16 %v163_v30, %v160_v24  ;;  %v386_v33 = vpack.c.bf16 %v195_v31, %v192_v25 }
  0xea   :  { %395 = vst [vmem:[#allocation2 + $0x18] sm:$0xff] %v371_v28   ;;  %399 = vst [vmem:[#allocation2 + $0x38] sm:$0xff] %v391_v29  }
  0xeb   :  { %394 = vst [vmem:[#allocation2 + $0x10] sm:$0xff] %v366_v32   ;;  %398 = vst [vmem:[#allocation2 + $0x30] sm:$0xff] %v386_v33  }
  0xec   :  { %458 = shalt.err (!%p455_p4)
}
  0xed   :  { %s459_s4 = scalar_lea.hbm %s541_s2, 1024 }
  0xee   :  { %p460_p5 = scmp.ne.s32.totalorder %s541_s2, %s459_s4  ;;  %p463_p6 = scmp.lt.u32.totalorder %s459_s4, %s541_s2 }
  0xf0   :  { %p465_p7 = pnand %p463_p6, %p460_p5 }
  0xf2   :  { %468 = shalt.err (!%p465_p7)
}
  0xf3   :  { %s472_s9 = smov 64   ;;  %s473_s10 = smov 4  }
  0xf4   :  { %298 = dma.vmem_to_hbm [thread:$0]  %s293_s28, 1024, %s541_s2, [#allocation3], %s472_s9, %s472_s9, %s473_s10  }
  0xf5   :  { %469 = dma.done.wait [#allocation3], 1024  }
  0xf6   :  { %470 = vsyncadd [#allocation3], 4294966272 }
  0xf7   :  { %302 = vsyncpa [#allocation3], 1 }

</bundles_post_ra>
